<compile_context>
chip_gen: v7x
topology: tpu7x:2x2x1
jax: 0.10.0
libtpu: 0.0.40
codegen_flags: <defaults>
</compile_context>

<pallas_src>
import functools

import jax
import jax.numpy as jnp
from jax.experimental import pallas as pl
from jax.experimental.pallas import tpu as pltpu


def _patch_embed_kernel(p_ref, w_ref, b_ref, o_ref):
    # (TM, K) @ (K, E) on the MXU, f32 accumulation, f32 bias add, cast on store.
    acc = jnp.dot(p_ref[...], w_ref[...], preferred_element_type=jnp.float32)
    o_ref[...] = (acc + b_ref[...]).astype(o_ref.dtype)


def _round_up(a, b):
    return ((a + b - 1) // b) * b


@functools.partial(
    jax.jit,
    static_argnames=("patch_size", "compute_dtype", "out_dtype", "block_m"))
def patch_embed_3d(x, weight, bias, *, patch_size=(5, 16, 16),
                   compute_dtype=jnp.bfloat16, out_dtype=None, block_m=None):
    """x: (B, C, Z, Y, X)  weight: (E, C, pz, py, px)  bias: (E,) -> (B, N, E)."""
    B, C, Z, Y, X = x.shape
    E = weight.shape[0]
    pz, py, px = patch_size
    Zp, Yp, Xp = Z // pz, Y // py, X // px
    N = Zp * Yp * Xp
    K = C * pz * py * px
    M = B * N
    if out_dtype is None:
        out_dtype = x.dtype            # module parity; pass bf16 to halve output writes

    # Cast first so XLA fuses the cast into the patch-extraction transpose: one pass
    # reading x at f32 and writing the (M, K) patch matrix at bf16 width.
    xc = x.astype(compute_dtype)
    wc = weight.astype(compute_dtype)

    # --- glue: non-overlapping patch extraction (single fused XLA copy) -----------
    xpat = xc.reshape(B, C, Zp, pz, Yp, py, Xp, px)
    xpat = xpat.transpose(0, 2, 4, 6, 1, 3, 5, 7)      # (B, Zp, Yp, Xp, C, pz, py, px)
    patches = xpat.reshape(M, K)                       # (M, K) bf16

    w2d = wc.reshape(E, K).T                           # (K, E) bf16, resident in VMEM
    b2d = bias.astype(jnp.float32).reshape(1, E)       # (1, E) f32, resident in VMEM

    # --- row-tile selection --------------------------------------------------------
    # Large tiles hide DMA and amortize the ~0.35us per-grid-step overhead; cap at
    # 2048 rows (~13 MiB double-buffered with resident weights, well under the 32 MiB
    # scoped VMEM we request below).  Keep >= 2 grid steps once there is real work so
    # the "parallel" M axis can be sharded across v7x's two TensorCores.
    if block_m is None:
        if M >= 1024:
            block_m = min(2048, _round_up(pl.cdiv(M, 2), 256))
        else:
            block_m = _round_up(M, 8)
    block_m = min(_round_up(block_m, 8), _round_up(M, 8))

    grid = (pl.cdiv(M, block_m),)       # ragged last block handled by Pallas masking

    out = pl.pallas_call(
        _patch_embed_kernel,
        out_shape=jax.ShapeDtypeStruct((M, E), out_dtype),
        grid=grid,
        in_specs=[
            pl.BlockSpec((block_m, K), lambda i: (i, 0)),   # streamed, double-buffered
            pl.BlockSpec((K, E), lambda i: (0, 0)),          # weight resident in VMEM
            pl.BlockSpec((1, E), lambda i: (0, 0)),          # bias resident in VMEM
        ],
        out_specs=pl.BlockSpec((block_m, E), lambda i: (i, 0)),  # lane-dense (E=128)
        compiler_params=pltpu.CompilerParams(
            dimension_semantics=("parallel",),               # shard M across TCs (v7x)
            vmem_limit_bytes=32 * 1024 * 1024,               # >= default on all gens
        ),
    )(patches, w2d, b2d)

    return out.reshape(B, N, E)


if __name__ == "__main__":
    # Shapes consistent with the module defaults:
    #   in_channels=1, patch_size=(5, 16, 16), embed_dim=128
    pz, py, px = 5, 16, 16
    E = 128
    fan_in = 1 * pz * py * px

    def reference(x, weight, bias):
        B, C, Z, Y, X = x.shape
        xr = x.reshape(B, C, Z // pz, pz, Y // py, py, X // px, px)
        xr = xr.transpose(0, 2, 4, 6, 1, 3, 5, 7).reshape(B, -1, fan_in)
        return jnp.einsum("bnk,ek->bne", xr, weight.reshape(E, fan_in)) + bias

    key = jax.random.PRNGKey(0)
    kx, kw, kb = jax.random.split(key, 3)

    weight = jax.random.normal(kw, (E, 1, pz, py, px), dtype=jnp.float32) * (fan_in ** -0.5)
    bias = jax.random.normal(kb, (E,), dtype=jnp.float32) * 0.01

    # Case 1: default tiling, small M (single block, fewer valid rows than 128).
    B, C = 2, 1
    Z, Y, X = 2 * pz, 2 * py, 2 * px                 # (10, 32, 32) -> 8 patches/sample
    x = jax.random.normal(kx, (B, C, Z, Y, X), dtype=jnp.float32)

    out = jax.block_until_ready(patch_embed_3d(x, weight, bias, patch_size=(pz, py, px)))
    ref = reference(x, weight, bias)
    assert out.shape == (B, (Z // pz) * (Y // py) * (X // px), E)
    # bf16 inputs with f32 accumulation -> ~1e-2-level per-element error is expected.
    assert jnp.allclose(out, ref, atol=5e-2, rtol=5e-2)

    # Case 2: multi-block grid with a ragged last block (M=24, block_m=16 -> 2 steps,
    # second step has only 8 valid rows).  Exercises the masked boundary handling
    # that replaced the old jnp.pad + out[:M] slice.
    kx2 = jax.random.PRNGKey(1)
    Z2, Y2, X2 = 2 * pz, 3 * py, 2 * px              # N = 12 per sample -> M = 24
    x2 = jax.random.normal(kx2, (2, 1, Z2, Y2, X2), dtype=jnp.float32)
    out2 = jax.block_until_ready(
        patch_embed_3d(x2, weight, bias, patch_size=(pz, py, px), block_m=16))
    ref2 = reference(x2, weight, bias)
    assert out2.shape == (2, 12, E)
    assert jnp.allclose(out2, ref2, atol=5e-2, rtol=5e-2)

    print("KERNEL_OK")
</pallas_src>

<mosaic_0001>
module attributes {stable_mosaic.version = 11 : i64} {
  func.func @_patch_embed_kernel(%arg0: i32, %arg1: memref<16x1280xbf16, #tpu.memory_space<vmem>>, %arg2: memref<1280x128xbf16, #tpu.memory_space<vmem>>, %arg3: memref<1x128xf32, #tpu.memory_space<vmem>>, %arg4: memref<16x128xf32, #tpu.memory_space<vmem>>) attributes {dimension_semantics = [#tpu.dimension_semantics<parallel>], iteration_bounds = array<i64: 1>, scalar_prefetch = 0 : i64, scratch_operands = 0 : i64, tpu.core_type = #tpu.core_type<tc>, window_params = [{transform_indices = @transform_0, window_bounds = array<i64: 16, 1280>}, {pipeline_mode = #tpu.pipeline_mode<synchronous>, transform_indices = @transform_1, window_bounds = array<i64: 1280, 128>}, {pipeline_mode = #tpu.pipeline_mode<synchronous>, transform_indices = @transform_2, window_bounds = array<i64: 1, 128>}, {transform_indices = @transform_3, window_bounds = array<i64: 16, 128>}]} {
    %c0 = arith.constant 0 : index
    %c0_0 = arith.constant 0 : index
    %0 = vector.load %arg1[%c0, %c0_0] : memref<16x1280xbf16, #tpu.memory_space<vmem>>, vector<16x1280xbf16>
    %c0_1 = arith.constant 0 : index
    %c0_2 = arith.constant 0 : index
    %1 = vector.load %arg2[%c0_1, %c0_2] : memref<1280x128xbf16, #tpu.memory_space<vmem>>, vector<1280x128xbf16>
    %cst = arith.constant dense<0.000000e+00> : vector<16x128xf32>
    %2 = tpu.matmul %0, %1, %cst {dimension_numbers = #tpu.dot_dimension_numbers<[1], [0], [0], [1], [0, 0, 1, 1], [], []>} : vector<16x1280xbf16>, vector<1280x128xbf16>, vector<16x128xf32> -> vector<16x128xf32>
    %c0_3 = arith.constant 0 : index
    %c0_4 = arith.constant 0 : index
    %3 = vector.load %arg3[%c0_3, %c0_4] : memref<1x128xf32, #tpu.memory_space<vmem>>, vector<1x128xf32>
    %4 = vector.broadcast %3 : vector<1x128xf32> to vector<16x128xf32>
    %5 = arith.addf %2, %4 : vector<16x128xf32>
    %c0_5 = arith.constant 0 : index
    %c0_6 = arith.constant 0 : index
    %6 = vector.load %arg4[%c0_5, %c0_6] : memref<16x128xf32, #tpu.memory_space<vmem>>, vector<16x128xf32>
    tpu.vector_store %arg4[%c0_5, %c0_6], %5 {strides = array<i32>} : memref<16x128xf32, #tpu.memory_space<vmem>>, vector<16x128xf32>,
    return
  }
  func.func @transform_0(%arg0: i32) -> (i32, i32) {
    %c0_i32 = arith.constant 0 : i32
    %c0_i32_0 = arith.constant 0 : i32
    return %arg0, %c0_i32 : i32, i32
  }
  func.func @transform_1(%arg0: i32) -> (i32, i32) {
    %c0_i32 = arith.constant 0 : i32
    %c0_i32_0 = arith.constant 0 : i32
    %c0_i32_1 = arith.constant 0 : i32
    return %c0_i32, %c0_i32_0 : i32, i32
  }
  func.func @transform_2(%arg0: i32) -> (i32, i32) {
    %c0_i32 = arith.constant 0 : i32
    %c0_i32_0 = arith.constant 0 : i32
    %c0_i32_1 = arith.constant 0 : i32
    return %c0_i32, %c0_i32_0 : i32, i32
  }
  func.func @transform_3(%arg0: i32) -> (i32, i32) {
    %c0_i32 = arith.constant 0 : i32
    %c0_i32_0 = arith.constant 0 : i32
    return %arg0, %c0_i32 : i32, i32
  }
}

</mosaic_0001>

<bundles_post_ra>
// kernel: patch_embed_3d.1
= control target key start
LH: loop header
LB: loop body
LE: loop exit
PB: predicated region body
PF: predicated region fallthrough
CT: control target
= control target key end

     0   :  { %s1577_s0 = inlined_call_operand.vmem [shape: bf16[16,1280], index: 0, kind: input, shape index: {}]   ;;  %s1578_s1 = inlined_call_operand.vmem [shape: bf16[1280,128], index: 1, kind: input, shape index: {}]   ;;  %s1579_s2 = inlined_call_operand.vmem [shape: f32[1,128], index: 2, kind: input, shape index: {}]   ;;  %s1580_s3 = inlined_call_operand.hbm [shape: f32[16,128], index: 3, kind: output, shape index: {}]  }
   0x1   :  { %v1150_v0 = vld [vmem:[%s1578_s1 + $0x40] sm:$0xff]   ;;  %v1154_v4 = vld [vmem:[%s1578_s1 + $0x48] sm:$0xff]   ;;  %v1158_v8 = vld [vmem:[%s1578_s1 + $0x50] sm:$0xff]  }
   0x2   :  { %v1151_v1 = vld [vmem:[%s1578_s1] sm:$0xff]   ;;  %1037 = vmatprep.subr.bf16.mxu0 %v1150_v0  ;;  %v1155_v5 = vld [vmem:[%s1578_s1 + $0x8] sm:$0xff]   ;;  %v1159_v9 = vld [vmem:[%s1578_s1 + $0x10] sm:$0xff]  }
   0x3   :  { %v1152_v2 = vld [vmem:[%s1578_s1 + $0xc0] sm:$0xff]   ;;  %1038 = vmatpush3.bf16.msra.mxu0 %v1151_v1  ;;  %v1156_v6 = vld [vmem:[%s1578_s1 + $0xc8] sm:$0xff]   ;;  %v1160_v10 = vld [vmem:[%s1578_s1 + $0xd0] sm:$0xff]  }
   0x4   :  { %v1153_v3 = vld [vmem:[%s1578_s1 + $0x80] sm:$0xff]   ;;  %1059 = vmatprep.subr.bf16.mxu1 %v1152_v2  ;;  %1039 = vmatprep.subr.bf16.mxu0 %v1154_v4  ;;  %v1157_v7 = vld [vmem:[%s1578_s1 + $0x88] sm:$0xff]   ;;  %v1161_v11 = vld [vmem:[%s1578_s1 + $0x90] sm:$0xff]  }
   0x5   :  { %1060 = vmatpush3.bf16.msra.mxu1 %v1153_v3  ;;  %v1162_v12 = vld [vmem:[%s1578_s1 + $0x58] sm:$0xff]   ;;  %v1166_v16 = vld [vmem:[%s1578_s1 + $0x60] sm:$0xff]   ;;  %v1170_v20 = vld [vmem:[%s1578_s1 + $0x68] sm:$0xff]  }
   0x6   :  { %1061 = vmatprep.subr.bf16.mxu1 %v1156_v6  ;;  %v1163_v13 = vld [vmem:[%s1578_s1 + $0x18] sm:$0xff]   ;;  %v1167_v17 = vld [vmem:[%s1578_s1 + $0x20] sm:$0xff]   ;;  %v1171_v21 = vld [vmem:[%s1578_s1 + $0x28] sm:$0xff]  }
   0x7   :  { %1040 = vmatpush3.bf16.msra.mxu0 %v1155_v5  ;;  %v1164_v14 = vld [vmem:[%s1578_s1 + $0xd8] sm:$0xff]   ;;  %v1168_v18 = vld [vmem:[%s1578_s1 + $0xe0] sm:$0xff]   ;;  %v1172_v22 = vld [vmem:[%s1578_s1 + $0xe8] sm:$0xff]  }
   0x8   :  { %1041 = vmatprep.subr.bf16.mxu0 %v1158_v8  ;;  %v1165_v15 = vld [vmem:[%s1578_s1 + $0x98] sm:$0xff]   ;;  %v1169_v19 = vld [vmem:[%s1578_s1 + $0xa0] sm:$0xff]   ;;  %v1173_v23 = vld [vmem:[%s1578_s1 + $0xa8] sm:$0xff]  }
   0x9   :  { %1062 = vmatpush3.bf16.msra.mxu1 %v1157_v7  ;;  %v1174_v24 = vld [vmem:[%s1578_s1 + $0x70] sm:$0xff]   ;;  %v1178_v28 = vld [vmem:[%s1578_s1 + $0x78] sm:$0xff]   ;;  %v1181_v31 = vld [vmem:[%s1577_s0] ss:$40 sps:$4 sm:$0xff]  }
   0xa   :  { %1063 = vmatprep.subr.bf16.mxu1 %v1160_v10  ;;  %v1175_v25 = vld [vmem:[%s1578_s1 + $0x30] sm:$0xff]   ;;  %v1179_v29 = vld [vmem:[%s1578_s1 + $0x38] sm:$0xff]   ;;  %v1183_v32 = vld [vmem:[%s1577_s0 + $0x4] ss:$40 sps:$4 sm:$0xff]  }
   0xb   :  { %1042 = vmatpush3.bf16.msra.mxu0 %v1159_v9  ;;  %v1176_v26 = vld [vmem:[%s1578_s1 + $0xf0] sm:$0xff]   ;;  %v1180_v30 = vld [vmem:[%s1578_s1 + $0xf8] sm:$0xff]   ;;  %755 = vmatprep.mubr.bf16.mxu0 %v1183_v32  ;;  %v1185_v34 = vld [vmem:[%s1578_s1 + $0x140] sm:$0xff]  }
   0xc   :  { %1043 = vmatprep.subr.bf16.mxu0 %v1162_v12  ;;  %v1177_v27 = vld [vmem:[%s1578_s1 + $0xb0] sm:$0xff]   ;;  %v1184_v33 = vld [vmem:[%s1578_s1 + $0xb8] sm:$0xff]   ;;  %v1189_v37 = vld [vmem:[%s1578_s1 + $0x100] sm:$0xff]  }
   0xd   :  { %1064 = vmatpush3.bf16.msra.mxu1 %v1161_v11  ;;  %v1186_v35 = vld [vmem:[%s1577_s0 + $0x8] ss:$40 sps:$4 sm:$0xff]   ;;  %v1188_v36 = vld [vmem:[%s1577_s0 + $0xc] ss:$40 sps:$4 sm:$0xff]   ;;  %v1190_v38 = vld [vmem:[%s1578_s1 + $0x1c0] sm:$0xff]  }
   0xe   :  { %1065 = vmatprep.subr.bf16.mxu1 %v1164_v14  ;;  %796 = vmatprep.mubr.bf16.mxu1 %v1188_v36  ;;  %v1191_v39 = vld [vmem:[%s1578_s1 + $0x180] sm:$0xff]   ;;  %v1192_v40 = vld [vmem:[%s1578_s1 + $0x148] sm:$0xff]   ;;  %v1196_v44 = vld [vmem:[%s1578_s1 + $0x150] sm:$0xff]  }
   0xf   :  { %1044 = vmatpush3.bf16.msra.mxu0 %v1163_v13  ;;  %v1193_v41 = vld [vmem:[%s1578_s1 + $0x108] sm:$0xff]   ;;  %v1197_v45 = vld [vmem:[%s1578_s1 + $0x110] sm:$0xff]   ;;  %v1200_v48 = vld [vmem:[%s1578_s1 + $0x158] sm:$0xff]  }
  0x10   :  { %1045 = vmatprep.subr.bf16.mxu0 %v1166_v16  ;;  %v1194_v42 = vld [vmem:[%s1578_s1 + $0x1c8] sm:$0xff]   ;;  %v1198_v46 = vld [vmem:[%s1578_s1 + $0x1d0] sm:$0xff]   ;;  %v1201_v49 = vld [vmem:[%s1578_s1 + $0x118] sm:$0xff]  }
  0x11   :  { %1066 = vmatpush3.bf16.msra.mxu1 %v1165_v15  ;;  %v1195_v43 = vld [vmem:[%s1578_s1 + $0x188] sm:$0xff]   ;;  %v1199_v47 = vld [vmem:[%s1578_s1 + $0x190] sm:$0xff]   ;;  %v1202_v50 = vld [vmem:[%s1578_s1 + $0x1d8] sm:$0xff]  }
  0x12   :  { %1067 = vmatprep.subr.bf16.mxu1 %v1168_v18  ;;  %v1203_v51 = vld [vmem:[%s1578_s1 + $0x198] sm:$0xff]   ;;  %v1204_v52 = vld [vmem:[%s1578_s1 + $0x160] sm:$0xff]   ;;  %v1208_v56 = vld [vmem:[%s1578_s1 + $0x168] sm:$0xff]  }
  0x13   :  { %1046 = vmatpush3.bf16.msra.mxu0 %v1167_v17  ;;  %v1205_v53 = vld [vmem:[%s1578_s1 + $0x120] sm:$0xff]   ;;  %v1209_v57 = vld [vmem:[%s1578_s1 + $0x128] sm:$0xff]   ;;  %v1212_v60 = vld [vmem:[%s1578_s1 + $0x170] sm:$0xff]  }
  0x14   :  { %1047 = vmatprep.subr.bf16.mxu0 %v1170_v20  ;;  %v1206_v54 = vld [vmem:[%s1578_s1 + $0x1e0] sm:$0xff]   ;;  %v1210_v58 = vld [vmem:[%s1578_s1 + $0x1e8] sm:$0xff]   ;;  %v1213_v61 = vld [vmem:[%s1578_s1 + $0x130] sm:$0xff]  }
  0x15   :  { %1068 = vmatpush3.bf16.msra.mxu1 %v1169_v19  ;;  %v1207_v55 = vld [vmem:[%s1578_s1 + $0x1a0] sm:$0xff]   ;;  %v1211_v59 = vld [vmem:[%s1578_s1 + $0x1a8] sm:$0xff]   ;;  %v1214_v62 = vld [vmem:[%s1578_s1 + $0x1f0] sm:$0xff]  }
  0x16   :  { %1069 = vmatprep.subr.bf16.mxu1 %v1172_v22  ;;  %v1215_v63 = vld [vmem:[%s1578_s1 + $0x1b0] sm:$0xff]   ;;  %v1216_v0 = vld [vmem:[%s1578_s1 + $0x178] sm:$0xff]   ;;  %v1223_v6 = vld [vmem:[%s1578_s1 + $0x240] sm:$0xff]  }
  0x17   :  { %1048 = vmatpush3.bf16.msra.mxu0 %v1171_v21  ;;  %v1217_v1 = vld [vmem:[%s1578_s1 + $0x138] sm:$0xff]   ;;  %v1227_v9 = vld [vmem:[%s1578_s1 + $0x200] sm:$0xff]   ;;  %v1228_v10 = vld [vmem:[%s1578_s1 + $0x248] sm:$0xff]  }
  0x18   :  { %1049 = vmatprep.subr.bf16.mxu0 %v1174_v24  ;;  %v1218_v2 = vld [vmem:[%s1578_s1 + $0x1f8] sm:$0xff]   ;;  %v1229_v11 = vld [vmem:[%s1578_s1 + $0x208] sm:$0xff]   ;;  %v1230_v12 = vld [vmem:[%s1578_s1 + $0x250] sm:$0xff]  }
  0x19   :  { %1070 = vmatpush3.bf16.msra.mxu1 %v1173_v23  ;;  %v1219_v3 = vld [vmem:[%s1577_s0 + $0x10] ss:$40 sps:$4 sm:$0xff]   ;;  %v1221_v4 = vld [vmem:[%s1577_s0 + $0x14] ss:$40 sps:$4 sm:$0xff]   ;;  %v1234_v16 = vld [vmem:[%s1578_s1 + $0x260] sm:$0xff]  }
  0x1a   :  { %1071 = vmatprep.subr.bf16.mxu1 %v1176_v26  ;;  %v1222_v5 = vld [vmem:[%s1578_s1 + $0x1b8] sm:$0xff]   ;;  %v1231_v13 = vld [vmem:[%s1578_s1 + $0x210] sm:$0xff]   ;;  %v1235_v17 = vld [vmem:[%s1578_s1 + $0x220] sm:$0xff]  }
  0x1b   :  { %1050 = vmatpush3.bf16.msra.mxu0 %v1175_v25  ;;  %v1224_v7 = vld [vmem:[%s1577_s0 + $0x18] ss:$40 sps:$4 sm:$0xff]   ;;  %v1226_v8 = vld [vmem:[%s1577_s0 + $0x1c] ss:$40 sps:$4 sm:$0xff]   ;;  %v1236_v18 = vld [vmem:[%s1578_s1 + $0x268] sm:$0xff]  }
  0x1c   :  { %1051 = vmatprep.subr.bf16.mxu0 %v1178_v28  ;;  %v1232_v14 = vld [vmem:[%s1578_s1 + $0x258] sm:$0xff]   ;;  %v1244_v19 = vld [vmem:[%s1577_s0 + $0x24] ss:$40 sps:$4 sm:$0xff]  }
  0x1d   :  { %1072 = vmatpush3.bf16.msra.mxu1 %v1177_v27  ;;  %v1233_v15 = vld [vmem:[%s1578_s1 + $0x218] sm:$0xff]  }
  0x1e   :  { %1073 = vmatprep.subr.bf16.mxu1 %v1180_v30 }
  0x1f   :  { %1052 = vmatpush3.bf16.msra.mxu0 %v1179_v29 }
  0x20   :  { %1081 = vmatprep.subr.bf16.mxu0 %v1185_v34 }
  0x21   :  { %1074 = vmatpush3.bf16.msra.mxu1 %v1184_v33 }
  0x22   :  { %756 = vmatmul.mubr.bf16.vlgmr.msra.gmra.mrb[0].mxu0 %v1181_v31  ;;  %1103 = vmatprep.subr.bf16.mxu1 %v1190_v38 }
  0x23   :  { %1082 = vmatpush3.bf16.msra.mxu0 %v1189_v37  ;;  %837 = vmatprep.mubr.bf16.mxu0 %v1221_v4 }
  0x24   :  { %797 = vmatmul.mubr.bf16.vlgmr.msra.gmra.mrb[0].mxu1 %v1186_v35  ;;  %1083 = vmatprep.subr.bf16.mxu0 %v1192_v40 }
  0x25   :  { %1104 = vmatpush3.bf16.msra.mxu1 %v1191_v39  ;;  %878 = vmatprep.mubr.bf16.mxu1 %v1226_v8 }
  0x26   :  { %1105 = vmatprep.subr.bf16.mxu1 %v1194_v42 }
  0x27   :  { %1084 = vmatpush3.bf16.msra.mxu0 %v1193_v41 }
  0x28   :  { %1085 = vmatprep.subr.bf16.mxu0 %v1196_v44 }
  0x29   :  { %1106 = vmatpush3.bf16.msra.mxu1 %v1195_v43 }
  0x2a   :  { %1107 = vmatprep.subr.bf16.mxu1 %v1198_v46 }
  0x2b   :  { %1086 = vmatpush3.bf16.msra.mxu0 %v1197_v45 }
  0x2c   :  { %1087 = vmatprep.subr.bf16.mxu0 %v1200_v48 }
  0x2d   :  { %1108 = vmatpush3.bf16.msra.mxu1 %v1199_v47 }
  0x2e   :  { %1109 = vmatprep.subr.bf16.mxu1 %v1202_v50 }
  0x2f   :  { %1088 = vmatpush3.bf16.msra.mxu0 %v1201_v49 }
  0x30   :  { %1089 = vmatprep.subr.bf16.mxu0 %v1204_v52 }
  0x31   :  { %1110 = vmatpush3.bf16.msra.mxu1 %v1203_v51 }
  0x32   :  { %1111 = vmatprep.subr.bf16.mxu1 %v1206_v54 }
  0x33   :  { %1090 = vmatpush3.bf16.msra.mxu0 %v1205_v53 }
  0x34   :  { %1091 = vmatprep.subr.bf16.mxu0 %v1208_v56 }
  0x35   :  { %1112 = vmatpush3.bf16.msra.mxu1 %v1207_v55 }
  0x36   :  { %1113 = vmatprep.subr.bf16.mxu1 %v1210_v58 }
  0x37   :  { %1092 = vmatpush3.bf16.msra.mxu0 %v1209_v57 }
  0x38   :  { %1093 = vmatprep.subr.bf16.mxu0 %v1212_v60 }
  0x39   :  { %1114 = vmatpush3.bf16.msra.mxu1 %v1211_v59 }
  0x3a   :  { %1115 = vmatprep.subr.bf16.mxu1 %v1214_v62 }
  0x3b   :  { %1094 = vmatpush3.bf16.msra.mxu0 %v1213_v61 }
  0x3c   :  { %1095 = vmatprep.subr.bf16.mxu0 %v1216_v0 }
  0x3d   :  { %1116 = vmatpush3.bf16.msra.mxu1 %v1215_v63 }
  0x3e   :  { %1117 = vmatprep.subr.bf16.mxu1 %v1218_v2 }
  0x3f   :  { %1096 = vmatpush3.bf16.msra.mxu0 %v1217_v1 }
  0x40   :  { %1125 = vmatprep.subr.bf16.mxu0 %v1223_v6 }
  0x41   :  { %1118 = vmatpush3.bf16.msra.mxu1 %v1222_v5 }
  0x42   :  { %838 = vmatmul.mubr.bf16.vlgmr.msra.gmra.mrb[4].mxu0 %v1219_v3 }
  0x43   :  { %1126 = vmatpush3.bf16.msra.mxu0 %v1227_v9 }
  0x44   :  { %879 = vmatmul.mubr.bf16.vlgmr.msra.gmra.mrb[4].mxu1 %v1224_v7  ;;  %1127 = vmatprep.subr.bf16.mxu0 %v1228_v10 }
  0x47   :  { %1128 = vmatpush3.bf16.msra.mxu0 %v1229_v11 }
  0x48   :  { %1129 = vmatprep.subr.bf16.mxu0 %v1230_v12 }
  0x4b   :  { %1130 = vmatpush3.bf16.msra.mxu0 %v1231_v13 }
  0x4c   :  { %1131 = vmatprep.subr.bf16.mxu0 %v1232_v14 }
  0x4f   :  { %1132 = vmatpush3.bf16.msra.mxu0 %v1233_v15 }
  0x50   :  { %1133 = vmatprep.subr.bf16.mxu0 %v1234_v16 }
  0x51   :  { %8 = vsyncpa [#allocation3], 0  ;;  %919 = vmatprep.mubr.bf16.mxu0 %v1244_v19  ;;  %v1237_v20 = vld [vmem:[%s1578_s1 + $0x228] sm:$0xff]   ;;  %v1238_v21 = vld [vmem:[%s1578_s1 + $0x270] sm:$0xff]  }
  0x52   :  { %v1239_v22 = vld [vmem:[%s1578_s1 + $0x230] sm:$0xff]   ;;  %v1240_v23 = vld [vmem:[%s1578_s1 + $0x278] sm:$0xff]   ;;  %v1242_v25 = vld [vmem:[%s1577_s0 + $0x20] ss:$40 sps:$4 sm:$0xff]   ;;  %s1269_s0 = smov [#allocation2]  }
  0x53   :  { %1134 = vmatpush3.bf16.msra.mxu0 %v1235_v17  ;;  %v1241_v24 = vld [vmem:[%s1578_s1 + $0x238] sm:$0xff]   ;;  %v946_v27 = vld [vmem:[%s1579_s2] ss:$0 sm:$0xff]  ;;  %s935_s1 = sshll.u32 %s1269_s0, 4  ;;  %s936_s1 = int_to_ptr.vmem [resolvable:$true] %s935_s1 }
  0x54   :  { %1135 = vmatprep.subr.bf16.mxu0 %v1236_v18  ;;  %s1245_s2 = scalar_lea.vmem %s936_s1, 256  ;;  %p1250_p1 = scmp.lt.s32.totalorder %s936_s1, %s936_s1 }
  0x55   :  { %p1246_p0 = scmp.ne.s32.totalorder %s936_s1, %s1245_s2  ;;  %p1251_p2 = scmp.lt.s32.totalorder %s1245_s2, %s1245_s2 }
  0x57   :  { %1136 = vmatpush3.bf16.msra.mxu0 %v1237_v20  ;;  %p1252_p3 = por %p1251_p2, %p1250_p1 }
  0x58   :  { %1137 = vmatprep.subr.bf16.mxu0 %v1238_v21 }
  0x59   :  { %p1253_p4 = pnand %p1252_p3, %p1246_p0 }
  0x5b   :  { %1138 = vmatpush3.bf16.msra.mxu0 %v1239_v22 }
  0x5c   :  { %1139 = vmatprep.subr.bf16.mxu0 %v1240_v23 }
  0x5f   :  { %1140 = vmatpush3.bf16.msra.mxu0 %v1241_v24 }
  0x62   :  { %920 = vmatmul.mubr.bf16.vlgmr.msra.gmra.mrb[8].mxu0 %v1242_v25 }
  0xf5   :  { %v1053_v26 = vpop.f32.mrb[0].mxu0 }
  0xf6   :  { %v1054_v28 = vpop.f32.mrb[1].mxu0 }
  0xf7   :  { %v1055_v29 = vadd.f32 %v1054_v28, %v1053_v26  ;;  %v1056_v30 = vpop.f32.mrb[2].mxu0  ;;  %v1075_v31 = vpop.f32.mrb[0].mxu1 }
  0xf8   :  { %v1057_v32 = vpop.f32.mrb[3].mxu0  ;;  %v1076_v35 = vpop.f32.mrb[1].mxu1 }
  0xf9   :  { %v758_v33 = vadd.f32 %v1055_v29, %v946_v27  ;;  %v1058_v34 = vadd.f32 %v1057_v32, %v1056_v30  ;;  %v1077_v36 = vadd.f32 %v1076_v35, %v1075_v31  ;;  %v1078_v37 = vpop.f32.mrb[2].mxu1 }
  0xfa   :  { %v1079_v39 = vpop.f32.mrb[3].mxu1 }
  0xfb   :  { %v761_v38 = vadd.f32 %v1058_v34, %v946_v27  ;;  %v799_v40 = vadd.f32 %v1077_v36, %v758_v33  ;;  %v1080_v41 = vadd.f32 %v1079_v39, %v1078_v37 }
  0xfd   :  { %v802_v42 = vadd.f32 %v1080_v41, %v761_v38 }
 0x115   :  { %v1097_v43 = vpop.f32.mrb[4].mxu0 }
 0x116   :  { %v1098_v44 = vpop.f32.mrb[5].mxu0 }
 0x117   :  { %v1099_v45 = vadd.f32 %v1098_v44, %v1097_v43  ;;  %v1100_v46 = vpop.f32.mrb[6].mxu0  ;;  %v1119_v49 = vpop.f32.mrb[4].mxu1 }
 0x118   :  { %v1101_v47 = vpop.f32.mrb[7].mxu0  ;;  %v1120_v51 = vpop.f32.mrb[5].mxu1 }
 0x119   :  { %v840_v48 = vadd.f32 %v1099_v45, %v799_v40  ;;  %v1102_v50 = vadd.f32 %v1101_v47, %v1100_v46  ;;  %v1121_v53 = vadd.f32 %v1120_v51, %v1119_v49  ;;  %v1122_v54 = vpop.f32.mrb[6].mxu1 }
 0x11a   :  { %v1123_v55 = vpop.f32.mrb[7].mxu1 }
 0x11b   :  { %v843_v52 = vadd.f32 %v1102_v50, %v802_v42  ;;  %v881_v56 = vadd.f32 %v1121_v53, %v840_v48  ;;  %v1124_v57 = vadd.f32 %v1123_v55, %v1122_v54 }
 0x11d   :  { %v884_v58 = vadd.f32 %v1124_v57, %v843_v52 }
 0x135   :  { %v1141_v59 = vpop.f32.mrb[8].mxu0 }
 0x136   :  { %v1142_v60 = vpop.f32.mrb[9].mxu0 }
 0x137   :  { %v1143_v61 = vadd.f32 %v1142_v60, %v1141_v59  ;;  %v1144_v62 = vpop.f32.mrb[10].mxu0 }
 0x138   :  { %v1145_v63 = vpop.f32.mrb[11].mxu0 }
 0x139   :  { %v922_v0 = vadd.f32 %v1143_v61, %v881_v56  ;;  %v1146_v1 = vadd.f32 %v1145_v63, %v1144_v62 }
 0x13b   :  { %928 = vst [vmem:[#allocation2] sm:$0xff] %v922_v0  ;;  %v925_v2 = vadd.f32 %v1146_v1, %v884_v58 }
 0x13d   :  { %929 = vst [vmem:[#allocation2 + $0x8] sm:$0xff] %v925_v2 }
 0x13e   :  { %1256 = shalt.err (!%p1253_p4)
}
 0x13f   :  { %s1257_s7 = scalar_lea.hbm %s1580_s3, 256 }
 0x140   :  { %p1258_p5 = scmp.ne.s32.totalorder %s1580_s3, %s1257_s7  ;;  %p1261_p6 = scmp.lt.u32.totalorder %s1257_s7, %s1580_s3 }
 0x142   :  { %p1263_p7 = pnand %p1261_p6, %p1258_p5 }
 0x144   :  { %1266 = shalt.err (!%p1263_p7)
}
 0x145   :  { %s1270_s12 = smov 128   ;;  %s1271_s13 = smov 8  }
 0x146   :  { %941 = dma.vmem_to_hbm [thread:$0]  %s936_s1, 256, %s1580_s3, [#allocation3], %s1270_s12, %s1270_s12, %s1271_s13  }
 0x147   :  { %1267 = dma.done.wait [#allocation3], 256  }
 0x148   :  { %1268 = vsyncadd [#allocation3], 4294967040 }
 0x149   :  { %945 = vsyncpa [#allocation3], 1 }

</bundles_post_ra>
